<compile_context>
chip_gen: v7x
topology: tpu7x:2x2x1
jax: 0.10.0
libtpu: 0.0.40
codegen_flags: <defaults>
</compile_context>

<pallas_src>
import functools

import jax
import jax.numpy as jnp
from jax import lax
from jax.experimental import pallas as pl
from jax.experimental.pallas import tpu as pltpu


def _round_up(a: int, b: int) -> int:
    return ((a + b - 1) // b) * b


def _cdiv(a: int, b: int) -> int:
    return -(-a // b)


def _num_tensorcores() -> int:
    """1 on single-TC chips (v5e / v6e), 2 on megacore-style chips (v4 / v5p / v7x)."""
    try:
        kind = jax.devices()[0].device_kind.lower()
    except Exception:
        return 1
    return 2 if any(tag in kind for tag in ("v7", "v5p", "v4")) else 1


def _choose_layout(n: int, c: int):
    """Pick (fold, c_pad, n_eff) so (n_eff, c_pad) reshapes row-major to
    (n_eff // fold, fold * c_pad) lane-dense rows with as little copying as possible."""
    if c >= 128:
        c_pad = _round_up(c, 128)            # copies only if c % 128 != 0
        return 1, c_pad, n
    c_pad = 1
    while c_pad < c:
        c_pad *= 2                           # 1,2,4,...,128 -- all divide 128
    fold_ideal = 128 // c_pad
    if c_pad != c:
        # Column pad already costs one host copy; pad rows in the same copy.
        return fold_ideal, c_pad, _round_up(n, fold_ideal)
    if n % fold_ideal == 0:
        return fold_ideal, c_pad, n          # perfectly lane-dense, zero copies
    # Ragged N: try a divisor-of-N fold so the reshape stays copy-free.
    best = 1
    for f in range(2, fold_ideal + 1):
        if n % f == 0:
            best = f
    if best * c_pad >= 64:                   # at least half a vreg of lanes
        return best, c_pad, n
    # Pathological N (e.g. prime): tiny zero-row pad (one small host copy).
    return fold_ideal, c_pad, _round_up(n, fold_ideal)


def _mcrmse_partial_kernel(yt_ref, yp_ref, o_ref, *, block_rows, lane_w,
                           acc_rows, m_rows, steps, need_mask):
    """Accumulate an (acc_rows, lane_w) sum-of-squares tile into the resident output."""
    p = pl.program_id(0)          # TensorCore split ("parallel")
    i = pl.program_id(1)          # reduction steps ("arbitrary", last grid axis)

    @pl.when(i == 0)
    def _():
        o_ref[...] = jnp.zeros_like(o_ref)

    d = yt_ref[...].astype(jnp.float32) - yp_ref[...].astype(jnp.float32)
    sq = d * d

    if need_mask:
        # Zero the garbage rows of the (possibly partial / clamped-duplicate) block.
        start = (p * steps + i) * block_rows           # logical folded-row offset
        rem = m_rows - start                           # valid rows left in this block
        row_ids = lax.broadcasted_iota(jnp.int32, (block_rows, 1), 0)
        sq = jnp.where(row_ids < rem, sq, 0.0)

    if block_rows == acc_rows:
        part = sq
    else:
        # Fold rows onto acc_rows sublanes: (block_rows, W) -> (g, 32, W), sum over
        # the tile-aligned leading axis (pure VPU adds); 4 f32 accumulator vregs give
        # independent add chains.  The cross-sublane/lane reduce happens once, outside.
        part = jnp.sum(sq.reshape(block_rows // acc_rows, acc_rows, lane_w), axis=0)
    o_ref[...] += part


def mcrmse_loss(y_true, y_pred, *, block_rows=None, n_splits=None):
    """Mean column-wise RMSE.  y_true, y_pred: (N, C) arrays -> f32 scalar."""
    assert y_true.shape == y_pred.shape and y_true.ndim == 2
    n, c = y_true.shape
    if n_splits is None:
        n_splits = _num_tensorcores()

    fold, c_pad, n_eff = _choose_layout(n, c)
    lane_w = fold * c_pad
    m = n_eff // fold                                   # folded rows

    def _prep(y):
        if (n_eff, c_pad) != (n, c):
            y = jnp.pad(y, ((0, n_eff - n), (0, c_pad - c)))   # zero rows/cols -> d == 0
        return y.reshape(m, lane_w)                     # free row-major view

    yt = _prep(y_true)
    yp = _prep(y_pred)

    acc_rows = 32                                       # 4 f32 vregs of accumulator
    itemsize = jnp.dtype(y_true.dtype).itemsize
    if block_rows is None:
        # ~2 MiB per input block: amortizes per-step overhead on v5e/v6e and keeps
        # v7x on its HBM roofline.  2 inputs x 2 buffers stays well inside VMEM.
        tgt = 2 * 1024 * 1024
        block_rows = max(acc_rows, (tgt // (lane_w * itemsize)) // acc_rows * acc_rows)
    block_rows = max(acc_rows,
                     min(_round_up(block_rows, acc_rows),
                         _round_up(_cdiv(m, n_splits), acc_rows)))

    blocks_total = _cdiv(m, block_rows)
    steps = _cdiv(blocks_total, n_splits)
    need_mask = (blocks_total * block_rows != m) or (n_splits * steps != blocks_total)

    if n_splits * steps == blocks_total:
        in_index = lambda p, i: (p * steps + i, 0)
    else:
        # Clamp so no block is fully out of bounds; the kernel fully masks duplicates.
        last = blocks_total - 1
        in_index = lambda p, i: (jnp.minimum(p * steps + i, last), 0)
    in_spec = pl.BlockSpec((block_rows, lane_w), in_index)

    in_block_bytes = block_rows * lane_w * itemsize
    # 2 inputs x double buffering + accumulator/output + headroom; safe on all
    # generations (incl. v7x's 64 MiB physical VMEM).
    vmem_bytes = int(min(32 * 1024 * 1024,
                         max(4 * 1024 * 1024, 4 * in_block_bytes + (2 << 20))))

    kernel = functools.partial(_mcrmse_partial_kernel,
                               block_rows=block_rows, lane_w=lane_w,
                               acc_rows=acc_rows, m_rows=m, steps=steps,
                               need_mask=need_mask)

    # TODO(synk): switch the split axis to pltpu.CORE_PARALLEL once core-parallel
    # pallas grids are verified on v7x; "parallel" is the portable megacore hint.
    partial_sums = pl.pallas_call(
        kernel,
        out_shape=jax.ShapeDtypeStruct((n_splits * acc_rows, lane_w), jnp.float32),
        grid_spec=pltpu.PrefetchScalarGridSpec(
            num_scalar_prefetch=0,
            grid=(n_splits, steps),
            in_specs=[in_spec, in_spec],
            out_specs=pl.BlockSpec((acc_rows, lane_w), lambda p, i: (p, 0)),
        ),
        compiler_params=pltpu.CompilerParams(
            dimension_semantics=("parallel", "arbitrary"),
            vmem_limit_bytes=vmem_bytes,
        ),
    )(yt, yp)

    # Tiny epilogue: decode lanes back to columns, drop pad columns, then
    # mse -> rmse -> mean (a handful of flops).  Padded rows/cols contributed 0.
    col_ss = jnp.sum(partial_sums.reshape(-1, c_pad), axis=0)[:c]
    colwise_mse = col_ss / n
    return jnp.mean(jnp.sqrt(colwise_mse))


def _ref_loss(y_true, y_pred):
    yt = y_true.astype(jnp.float32)
    yp = y_pred.astype(jnp.float32)
    return jnp.mean(jnp.sqrt(jnp.mean(jnp.square(yt - yp), axis=0)))


if __name__ == "__main__":
    key = jax.random.PRNGKey(0)

    def _check(loss_fn, shape, dtype, k):
        k1, k2 = jax.random.split(k)
        yt = jax.random.normal(k1, shape, dtype=dtype)
        yp = jax.random.normal(k2, shape, dtype=dtype)
        out = jax.block_until_ready(loss_fn(yt, yp))
        ref = _ref_loss(yt, yp)
        assert jnp.allclose(out, ref, rtol=1e-5, atol=1e-6), (shape, dtype, out, ref)

    keys = jax.random.split(key, 6)
    default_fn = jax.jit(mcrmse_loss)

    # 1) Small divisible shape (fold=16, single partial block, in-kernel mask).
    _check(default_fn, (32, 8), jnp.float32, keys[0])
    # 2) Ragged N: divisor fold (15 -> 120 lanes), zero host-side copies.
    _check(default_fn, (300, 8), jnp.float32, keys[1])
    # 3) bf16 inputs (half the HBM bytes; kernel casts to f32 internally).
    _check(default_fn, (64, 16), jnp.bfloat16, keys[2])
    # 4) C=6 (canonical MCRMSE): columns padded 6 -> 8 keep lanes dense.
    _check(default_fn, (50, 6), jnp.float32, keys[3])
    # 5) Multi-step reduction grid (forced small blocks), no masking needed.
    _check(jax.jit(functools.partial(mcrmse_loss, block_rows=32)),
           (2048, 8), jnp.float32, keys[4])
    # 6) Two-way split with uneven block count (clamped index map + full-block mask).
    _check(jax.jit(functools.partial(mcrmse_loss, block_rows=32, n_splits=2)),
           (1536, 8), jnp.float32, keys[5])

    print("KERNEL_OK")
</pallas_src>

<mosaic_0001>
module attributes {stable_mosaic.version = 11 : i64} {
  func.func @_mcrmse_partial_kernel(%arg0: i32, %arg1: i32, %arg2: memref<32x128xf32, #tpu.memory_space<vmem>>, %arg3: memref<32x128xf32, #tpu.memory_space<vmem>>, %arg4: memref<32x128xf32, #tpu.memory_space<vmem>>) attributes {dimension_semantics = [#tpu.dimension_semantics<parallel>, #tpu.dimension_semantics<arbitrary>], iteration_bounds = array<i64: 1, 1>, scalar_prefetch = 0 : i64, scratch_operands = 0 : i64, tpu.core_type = #tpu.core_type<tc>, window_params = [{transform_indices = @transform_0, window_bounds = array<i64: 32, 128>}, {transform_indices = @transform_1, window_bounds = array<i64: 32, 128>}, {transform_indices = @transform_2, window_bounds = array<i64: 32, 128>}]} {
    %c0_i32 = arith.constant 0 : i32
    %0 = arith.cmpi eq, %arg1, %c0_i32 : i32
    %1 = arith.extui %0 : i1 to i32
    %c0_i32_0 = arith.constant 0 : i32
    %2 = arith.cmpi ne, %1, %c0_i32_0 : i32
    scf.if %2 {
      %cst_8 = arith.constant 0.000000e+00 : f32
      %21 = vector.broadcast %cst_8 : f32 to vector<32x128xf32>
      %c0_9 = arith.constant 0 : index
      %c0_10 = arith.constant 0 : index
      %22 = vector.load %arg4[%c0_9, %c0_10] : memref<32x128xf32, #tpu.memory_space<vmem>>, vector<32x128xf32>
      tpu.vector_store %arg4[%c0_9, %c0_10], %21 {strides = array<i32>} : memref<32x128xf32, #tpu.memory_space<vmem>>, vector<32x128xf32>,
    } else {
    }
    %c0 = arith.constant 0 : index
    %c0_1 = arith.constant 0 : index
    %3 = vector.load %arg2[%c0, %c0_1] : memref<32x128xf32, #tpu.memory_space<vmem>>, vector<32x128xf32>
    %c0_2 = arith.constant 0 : index
    %c0_3 = arith.constant 0 : index
    %4 = vector.load %arg3[%c0_2, %c0_3] : memref<32x128xf32, #tpu.memory_space<vmem>>, vector<32x128xf32>
    %5 = arith.subf %3, %4 : vector<32x128xf32>
    %6 = arith.mulf %5, %5 : vector<32x128xf32>
    %c1_i32 = arith.constant 1 : i32
    %7 = arith.muli %arg0, %c1_i32 : i32
    %8 = arith.addi %7, %arg1 : i32
    %c32_i32 = arith.constant 32 : i32
    %9 = arith.muli %8, %c32_i32 : i32
    %c2_i32 = arith.constant 2 : i32
    %10 = arith.subi %c2_i32, %9 : i32
    %11 = tpu.iota {dimensions = array<i32: 0>} : vector<32x1xi32>
    %12 = vector.broadcast %10 : i32 to vector<32x1xi32>
    %13 = arith.cmpi slt, %11, %12 : vector<32x1xi32>
    %cst = arith.constant 0.000000e+00 : f32
    %14 = vector.shape_cast %13 : vector<32x1xi1> to vector<32x1xi1>
    %15 = vector.broadcast %14 : vector<32x1xi1> to vector<32x128xi1>
    %16 = vector.broadcast %cst : f32 to vector<32x128xf32>
    %17 = arith.select %15, %6, %16 : vector<32x128xi1>, vector<32x128xf32>
    %c0_4 = arith.constant 0 : index
    %c0_5 = arith.constant 0 : index
    %18 = vector.load %arg4[%c0_4, %c0_5] : memref<32x128xf32, #tpu.memory_space<vmem>>, vector<32x128xf32>
    %19 = arith.addf %18, %17 : vector<32x128xf32>
    %c0_6 = arith.constant 0 : index
    %c0_7 = arith.constant 0 : index
    %20 = vector.load %arg4[%c0_6, %c0_7] : memref<32x128xf32, #tpu.memory_space<vmem>>, vector<32x128xf32>
    tpu.vector_store %arg4[%c0_6, %c0_7], %19 {strides = array<i32>} : memref<32x128xf32, #tpu.memory_space<vmem>>, vector<32x128xf32>,
    return
  }
  func.func @transform_0(%arg0: i32, %arg1: i32) -> (i32, i32) {
    %c1_i32 = arith.constant 1 : i32
    %0 = arith.muli %arg0, %c1_i32 : i32
    %1 = arith.addi %0, %arg1 : i32
    %c0_i32 = arith.constant 0 : i32
    %c0_i32_0 = arith.constant 0 : i32
    return %1, %c0_i32 : i32, i32
  }
  func.func @transform_1(%arg0: i32, %arg1: i32) -> (i32, i32) {
    %c1_i32 = arith.constant 1 : i32
    %0 = arith.muli %arg0, %c1_i32 : i32
    %1 = arith.addi %0, %arg1 : i32
    %c0_i32 = arith.constant 0 : i32
    %c0_i32_0 = arith.constant 0 : i32
    return %1, %c0_i32 : i32, i32
  }
  func.func @transform_2(%arg0: i32, %arg1: i32) -> (i32, i32) {
    %c0_i32 = arith.constant 0 : i32
    %c0_i32_0 = arith.constant 0 : i32
    return %arg0, %c0_i32 : i32, i32
  }
}

</mosaic_0001>

<bundles_post_ra>
// kernel: mcrmse_loss.1
= control target key start
LH: loop header
LB: loop body
LE: loop exit
PB: predicated region body
PF: predicated region fallthrough
CT: control target
= control target key end

     0   :  { %v102_v0 = vlaneseq  ;;  %v153_v3 = vmov 0.0   ;;  %s187_s2 = inlined_call_operand.vmem [shape: f32[32,128], index: 2, kind: output, shape index: {}]   ;;  %s188_s0 = inlined_call_operand.vmem [shape: f32[2,128], index: 0, kind: input, shape index: {}]   ;;  %s189_s1 = inlined_call_operand.vmem [shape: f32[2,128], index: 1, kind: input, shape index: {}]  }
   0x1   :  { %v83_v1 = vld [vmem:[%s188_s0] sm:$0xff]  ;;  %133 = vst [vmem:[%s187_s2 + $0x8] sm:$0xff] %v153_v3  ;;  %134 = vst [vmem:[%s187_s2 + $0x10] sm:$0xff] %v153_v3 }
   0x2   :  { %v87_v2 = vld [vmem:[%s189_s1] sm:$0xff]  ;;  %135 = vst [vmem:[%s187_s2 + $0x18] sm:$0xff] %v153_v3  ;;  %v103_v5 = vshrl.u32 %v102_v0, 7 }
   0x3   :  { %v91_v4 = vsub.f32 %v83_v1, %v87_v2 }
   0x4   :  { %vm108_vm0 = vcmp.lt.s32.totalorder %v103_v5, 2 }
   0x5   :  { %v95_v6 = vmul.f32 %v91_v4, %v91_v4 }
   0x7   :  { %v120_v7 = vsel %vm108_vm0, %v95_v6, 0.0 }
   0x8   :  { %132 = vst [vmem:[%s187_s2] sm:$0xff] %v120_v7 }

</bundles_post_ra>
